<compile_context>
chip_gen: v6e
topology: v6e:2x2x1
jax: 0.10.0
libtpu: 0.0.40
codegen_flags: <defaults>
</compile_context>

<pallas_src>
import jax
import jax.numpy as jnp
from jax.experimental import pallas as pl
from jax.experimental.pallas import tpu as pltpu


def fusion_kernel(cat_ref, w1b_ref, w2_ref, sb_ref, o_ref):
    # cat_ref: (B*N, F+2)  rows = [x_b | z_bn | 1]
    # w1b_ref: (F+2, H)    rows = [W1 ; b1]
    # w2_ref : (H, F)
    # sb_ref : (2, B*N, F) [0]=folded BN scale, [1]=folded BN shift (incl. b2)
    # o_ref  : (B*N, F)
    h = jnp.maximum(
        jnp.dot(cat_ref[...], w1b_ref[...], preferred_element_type=jnp.float32),
        0.0)                                                     # Linear1 + b1, ReLU
    y = jnp.dot(h, w2_ref[...], preferred_element_type=jnp.float32)   # Linear2 (no b2)
    o_ref[...] = (y * sb_ref[0] + sb_ref[1]).astype(o_ref.dtype)      # b2 + BN folded


def concat_fusion(x, z, w1, b1, w2, b2, bn_scale, bn_shift):
    """x: (B, F), z: (B, N).  Eval-mode ConcatFusionModule forward -> (B, N, F)."""
    B, Fx = x.shape
    Bz, N = z.shape
    H = w1.shape[1]
    assert Bz == B
    assert w1.shape[0] == Fx + 1
    # BatchNorm1d(init_dim) on the (B, n_z, F) output => channel dim is n_z.
    assert bn_scale.shape == (N,) and bn_shift.shape == (N,), \
        "BatchNorm1d channel count must equal n_z (PyTorch channel-dim constraint)"
    BN = B * N

    # ---- wrapper-side packing (tiny, traced once) ----
    # Activation slab: [x_b | z_bn | 1] so Linear1 (+b1) is one GEMM.
    x_rep = jnp.repeat(x, N, axis=0)                         # (B*N, F), row r -> x[r//N]
    z_col = z.reshape(BN, 1)                                 # (B*N, 1)
    ones = jnp.ones((BN, 1), x.dtype)
    cat1 = jnp.concatenate([x_rep, z_col, ones], axis=-1)    # (B*N, F+2)
    w1b = jnp.concatenate([w1, b1.reshape(1, H)], axis=0)    # (F+2, H)

    # Fold b2 + eval-mode BatchNorm into per-row scale / bias, tiled over batch.
    sc_nf = jnp.broadcast_to(bn_scale.reshape(1, N, 1), (B, N, Fx)).reshape(BN, Fx)
    bias_nf = bn_scale.reshape(N, 1) * b2.reshape(1, Fx) + bn_shift.reshape(N, 1)
    bias_nf = jnp.broadcast_to(bias_nf.reshape(1, N, Fx), (B, N, Fx)).reshape(BN, Fx)
    sb = jnp.stack([sc_nf, bias_nf], axis=0)                 # (2, B*N, F)

    flops = 2 * BN * (Fx + 2) * H + 2 * BN * H * Fx + 2 * BN * Fx
    bytes_accessed = 4 * (cat1.size + w1b.size + w2.size + sb.size + BN * Fx)

    out2d = pl.pallas_call(
        fusion_kernel,
        out_shape=jax.ShapeDtypeStruct((BN, Fx), jnp.float32),
        in_specs=[pl.BlockSpec(memory_space=pltpu.MemorySpace.VMEM)] * 4,
        out_specs=pl.BlockSpec(memory_space=pltpu.MemorySpace.VMEM),
        cost_estimate=pl.CostEstimate(flops=flops, transcendentals=0,
                                      bytes_accessed=bytes_accessed),
    )(cat1, w1b, w2, sb)
    return out2d.reshape(B, N, Fx)


def reference(x, z, w1, b1, w2, b2, bn_scale, bn_shift):
    N = z.shape[1]
    cat = jnp.concatenate(
        [jnp.repeat(x[:, None, :], N, axis=1), z[:, :, None]], axis=-1)
    h = jnp.maximum(cat @ w1 + b1, 0.0)
    y = h @ w2 + b2
    return y * bn_scale.reshape(1, N, 1) + bn_shift.reshape(1, N, 1)


if __name__ == "__main__":
    # init_dim = F_x = 16, n_z = 16 (must equal init_dim), hidden_dim = 32, batch = 4.
    B, Fx, N, H = 4, 16, 16, 32
    eps = 1e-5

    key = jax.random.PRNGKey(0)
    (kx, kz, kw1, kb1, kw2, kb2,
     kg, kbt, krm, krv) = jax.random.split(key, 10)

    x = jax.random.normal(kx, (B, Fx), dtype=jnp.float32)
    z = jax.random.normal(kz, (B, N), dtype=jnp.float32)

    # Deterministic parameter init (PyTorch-style scale).
    w1 = jax.random.uniform(kw1, (Fx + 1, H), jnp.float32, -1.0, 1.0) / jnp.sqrt(Fx + 1.0)
    b1 = jax.random.uniform(kb1, (H,), jnp.float32, -1.0, 1.0) / jnp.sqrt(Fx + 1.0)
    w2 = jax.random.uniform(kw2, (H, Fx), jnp.float32, -1.0, 1.0) / jnp.sqrt(float(H))
    b2 = jax.random.uniform(kb2, (Fx,), jnp.float32, -1.0, 1.0) / jnp.sqrt(float(H))

    # BatchNorm1d eval params (non-trivial running stats to exercise the fold).
    gamma = jax.random.uniform(kg, (N,), jnp.float32, 0.5, 1.5)
    beta = jax.random.normal(kbt, (N,), jnp.float32) * 0.1
    run_mean = jax.random.normal(krm, (N,), jnp.float32) * 0.1
    run_var = jax.random.uniform(krv, (N,), jnp.float32, 0.5, 2.0)
    bn_scale = gamma / jnp.sqrt(run_var + eps)
    bn_shift = beta - run_mean * bn_scale

    out = concat_fusion(x, z, w1, b1, w2, b2, bn_scale, bn_shift)
    out = jax.block_until_ready(out)

    ref = reference(x, z, w1, b1, w2, b2, bn_scale, bn_shift)
    assert out.shape == (B, N, Fx)
    assert jnp.allclose(out, ref, atol=2e-5, rtol=1e-5), "mismatch vs reference"

    print("KERNEL_OK")
</pallas_src>

<mosaic_0001>
module attributes {stable_mosaic.version = 11 : i64} {
  func.func @fusion_kernel(%arg0: memref<64x18xf32, #tpu.memory_space<vmem>>, %arg1: memref<18x32xf32, #tpu.memory_space<vmem>>, %arg2: memref<32x16xf32, #tpu.memory_space<vmem>>, %arg3: memref<2x64x16xf32, #tpu.memory_space<vmem>>, %arg4: memref<64x16xf32, #tpu.memory_space<vmem>>) attributes {dimension_semantics = [], scalar_prefetch = 0 : i64, scratch_operands = 0 : i64, tpu.core_type = #tpu.core_type<tc>} {
    %c0 = arith.constant 0 : index
    %c0_0 = arith.constant 0 : index
    %0 = vector.load %arg0[%c0, %c0_0] : memref<64x18xf32, #tpu.memory_space<vmem>>, vector<64x18xf32>
    %c0_1 = arith.constant 0 : index
    %c0_2 = arith.constant 0 : index
    %1 = vector.load %arg1[%c0_1, %c0_2] : memref<18x32xf32, #tpu.memory_space<vmem>>, vector<18x32xf32>
    %cst = arith.constant dense<0.000000e+00> : vector<64x32xf32>
    %2 = tpu.matmul %0, %1, %cst {dimension_numbers = #tpu.dot_dimension_numbers<[1], [0], [0], [1], [0, 0, 1, 1], [], []>} : vector<64x18xf32>, vector<18x32xf32>, vector<64x32xf32> -> vector<64x32xf32>
    %cst_3 = arith.constant 0.000000e+00 : f32
    %3 = vector.broadcast %cst_3 : f32 to vector<64x32xf32>
    %4 = arith.maximumf %2, %3 : vector<64x32xf32>
    %c0_4 = arith.constant 0 : index
    %c0_5 = arith.constant 0 : index
    %5 = vector.load %arg2[%c0_4, %c0_5] : memref<32x16xf32, #tpu.memory_space<vmem>>, vector<32x16xf32>
    %cst_6 = arith.constant dense<0.000000e+00> : vector<64x16xf32>
    %6 = tpu.matmul %4, %5, %cst_6 {dimension_numbers = #tpu.dot_dimension_numbers<[1], [0], [0], [1], [0, 0, 1, 1], [], []>} : vector<64x32xf32>, vector<32x16xf32>, vector<64x16xf32> -> vector<64x16xf32>
    %c0_7 = arith.constant 0 : index
    %c0_8 = arith.constant 0 : index
    %c0_9 = arith.constant 0 : index
    %7 = vector.load %arg3[%c0_7, %c0_8, %c0_9] : memref<2x64x16xf32, #tpu.memory_space<vmem>>, vector<1x64x16xf32>
    %8 = vector.shape_cast %7 : vector<1x64x16xf32> to vector<64x16xf32>
    %9 = arith.mulf %6, %8 : vector<64x16xf32>
    %c1 = arith.constant 1 : index
    %c0_10 = arith.constant 0 : index
    %c0_11 = arith.constant 0 : index
    %10 = vector.load %arg3[%c1, %c0_10, %c0_11] : memref<2x64x16xf32, #tpu.memory_space<vmem>>, vector<1x64x16xf32>
    %11 = vector.shape_cast %10 : vector<1x64x16xf32> to vector<64x16xf32>
    %12 = arith.addf %9, %11 : vector<64x16xf32>
    %c0_12 = arith.constant 0 : index
    %c0_13 = arith.constant 0 : index
    %13 = vector.load %arg4[%c0_12, %c0_13] : memref<64x16xf32, #tpu.memory_space<vmem>>, vector<64x16xf32>
    tpu.vector_store %arg4[%c0_12, %c0_13], %12 {strides = array<i32>} : memref<64x16xf32, #tpu.memory_space<vmem>>, vector<64x16xf32>,
    return
  }
}

</mosaic_0001>

<bundles_post_ra>
// kernel: tpu_custom_call.1
= control target key start
LH: loop header
LB: loop body
LE: loop exit
PB: predicated region body
PF: predicated region fallthrough
CT: control target
= control target key end

     0   :  { %vm53_vm0 = vcmask 1041408   ;;  %vm28_vm1 = vcmask 146432   ;;  %vm174_vm2 = vcmask 261120   ;;  %vm337_vm3 = vcmask 130048   ;;  %s602_s1 = inlined_call_operand.vmem [shape: f32[18,32], index: 1, kind: input, shape index: {}]   ;;  %s603_s0 = inlined_call_operand.vmem [shape: f32[64,18], index: 0, kind: input, shape index: {}]   ;;  %s604_s2 = inlined_call_operand.vmem [shape: f32[32,16], index: 2, kind: input, shape index: {}]   ;;  %s605_s3 = inlined_call_operand.vmem [shape: f32[2,64,16], index: 3, kind: input, shape index: {}]   ;;  %s606_s4 = inlined_call_operand.vmem [shape: f32[64,16], index: 4, kind: output, shape index: {}]  }
   0x1   :  { %v27_v0 = vld [vmem:[%s602_s1 + $0x10] sm:$0x3]  ;;  %v26_v1 = vld [vmem:[%s602_s1 + $0x8] sm:$0xff]  ;;  %v17_v2 = vld [vmem:[%s603_s0] sm:$0xff] }
   0x2   :  { %398 = vmatprep.subr.msk.mxu0 %vm53_vm0, %v27_v0  ;;  %v25_v3 = vld [vmem:[%s602_s1] sm:$0xff]  ;;  %404 = vmatprep.mubr.msk.f32.mxu0 %vm28_vm1, %v17_v2  ;;  %v173_v4 = vld [vmem:[%s604_s2 + $0x18] sm:$0xff]  ;;  %v18_v5 = vld [vmem:[%s603_s0 + $0x8] sm:$0xff] }
   0x3   :  { %399 = vmatpush3.msk.msra.mxu0 %vm53_vm0, %v27_v0  ;;  %416 = vmatprep.subr.mxu1 %v173_v4  ;;  %v19_v6 = vld [vmem:[%s603_s0 + $0x10] sm:$0xff]  ;;  %v20_v7 = vld [vmem:[%s603_s0 + $0x18] sm:$0xff]  ;;  %v21_v8 = vld [vmem:[%s603_s0 + $0x20] sm:$0xff] }
   0x4   :  { %400 = vmatprep.subr.mxu0 %v26_v1  ;;  %417 = vmatpush3.msra.mxu1 %v173_v4  ;;  %v22_v9 = vld [vmem:[%s603_s0 + $0x28] sm:$0xff]  ;;  %v23_v10 = vld [vmem:[%s603_s0 + $0x30] sm:$0xff]  ;;  %v24_v11 = vld [vmem:[%s603_s0 + $0x38] sm:$0xff] }
   0x5   :  { %401 = vmatpush3.msra.mxu0 %v26_v1  ;;  %v172_v12 = vld [vmem:[%s604_s2 + $0x10] sm:$0xff]  ;;  %v171_v13 = vld [vmem:[%s604_s2 + $0x8] sm:$0xff]  ;;  %v170_v14 = vld [vmem:[%s604_s2] sm:$0xff] }
   0x6   :  { %402 = vmatprep.subr.mxu0 %v25_v3  ;;  %418 = vmatprep.subr.mxu1 %v172_v12  ;;  %v305_v31 = vld [vmem:[%s605_s3 + $0x8] sm:$0xff]  ;;  %v304_v34 = vld [vmem:[%s605_s3] sm:$0xff]  ;;  %v307_v38 = vld [vmem:[%s605_s3 + $0x18] sm:$0xff] }
   0x7   :  { %403 = vmatpush3.msra.mxu0 %v25_v3  ;;  %419 = vmatpush3.msra.mxu1 %v172_v12  ;;  %v368_v33 = vld [vmem:[%s605_s3 + $0x48] sm:$0xff]  ;;  %v367_v37 = vld [vmem:[%s605_s3 + $0x40] sm:$0xff]  ;;  %v370_v42 = vld [vmem:[%s605_s3 + $0x58] sm:$0xff] }
   0x8   :  { %405 = vmatmul.mubr.msk.f32.vlgmr.msra.gmra.mxu0 %vm28_vm1, %v18_v5  ;;  %420 = vmatprep.subr.mxu1 %v171_v13  ;;  %v306_v43 = vld [vmem:[%s605_s3 + $0x10] sm:$0xff]  ;;  %v309_v48 = vld [vmem:[%s605_s3 + $0x28] sm:$0xff]  ;;  %v308_v53 = vld [vmem:[%s605_s3 + $0x20] sm:$0xff] }
   0x9   :  { %407 = vmatprep.mubr.msk.f32.mxu0 %vm28_vm1, %v19_v6  ;;  %421 = vmatpush3.msra.mxu1 %v171_v13  ;;  %v369_v47 = vld [vmem:[%s605_s3 + $0x50] sm:$0xff]  ;;  %v372_v52 = vld [vmem:[%s605_s3 + $0x68] sm:$0xff]  ;;  %v371_v57 = vld [vmem:[%s605_s3 + $0x60] sm:$0xff] }
   0xa   :  { %422 = vmatprep.subr.mxu1 %v170_v14  ;;  %v311_v58 = vld [vmem:[%s605_s3 + $0x38] sm:$0xff]  ;;  %v310_v63 = vld [vmem:[%s605_s3 + $0x30] sm:$0xff] }
   0xb   :  { %423 = vmatpush3.msra.mxu1 %v170_v14  ;;  %v374_v62 = vld [vmem:[%s605_s3 + $0x78] sm:$0xff]  ;;  %v373_v3 = vld [vmem:[%s605_s3 + $0x70] sm:$0xff] }
   0xc   :  { %408 = vmatmul.mubr.msk.f32.gmra.mxu0 %vm28_vm1, %v20_v7 }
   0xd   :  { %410 = vmatprep.mubr.msk.f32.mxu0 %vm28_vm1, %v21_v8 }
  0x10   :  { %411 = vmatmul.mubr.msk.f32.gmra.mxu0 %vm28_vm1, %v22_v9 }
  0x11   :  { %413 = vmatprep.mubr.msk.f32.mxu0 %vm28_vm1, %v23_v10 }
  0x14   :  { %414 = vmatmul.mubr.msk.f32.gmra.mxu0 %vm28_vm1, %v24_v11 }
  0xc8   :  { %v406_v15 = vpop.f32.mrf.mxu0 }
  0xc9   :  { %v163_v18 = vmax.f32 %v406_v15, 0.0 }
  0xca   :  { %v123_v16 = vpop.f32.mrf.mxu0 }
  0xcb   :  { %v162_v17 = vmax.f32 %v123_v16, 0.0 }
  0xcc   :  { %v409_v19 = vpop.f32.mrf.mxu0 }
  0xcd   :  { %424 = vmatprep.mubr.msk.f32.mxu1 %vm174_vm2, %v162_v17  ;;  %v165_v22 = vmax.f32 %v409_v19, 0.0 }
  0xce   :  { %v133_v20 = vpop.f32.mrf.mxu0  ;;  %425 = vmatmul.mubr.msk.f32.vlgmr.msra.gmra.mxu1 %vm174_vm2, %v163_v18 }
  0xcf   :  { %v164_v21 = vmax.f32 %v133_v20, 0.0 }
  0xd0   :  { %v412_v23 = vpop.f32.mrf.mxu0 }
  0xd1   :  { %427 = vmatprep.mubr.msk.f32.mxu1 %vm174_vm2, %v164_v21  ;;  %v167_v26 = vmax.f32 %v412_v23, 0.0 }
  0xd2   :  { %v143_v24 = vpop.f32.mrf.mxu0  ;;  %428 = vmatmul.mubr.msk.f32.gmra.mxu1 %vm174_vm2, %v165_v22 }
  0xd3   :  { %v166_v25 = vmax.f32 %v143_v24, 0.0 }
  0xd4   :  { %v415_v27 = vpop.f32.mrf.mxu0 }
  0xd5   :  { %430 = vmatprep.mubr.msk.f32.mxu1 %vm174_vm2, %v166_v25  ;;  %v169_v30 = vmax.f32 %v415_v27, 0.0 }
  0xd6   :  { %v153_v28 = vpop.f32.mrf.mxu0  ;;  %431 = vmatmul.mubr.msk.f32.gmra.mxu1 %vm174_vm2, %v167_v26 }
  0xd7   :  { %v168_v29 = vmax.f32 %v153_v28, 0.0 }
  0xd9   :  { %433 = vmatprep.mubr.msk.f32.mxu1 %vm174_vm2, %v168_v29 }
  0xda   :  { %434 = vmatmul.mubr.msk.f32.gmra.mxu1 %vm174_vm2, %v169_v30 }
 0x18e   :  { %v426_v32 = vpop.f32.mrf.mxu1 }
 0x18f   :  { %v313_v35 = vmul.f32 %v426_v32, %v305_v31 }
 0x190   :  { %v265_v36 = vpop.f32.mrf.mxu1 }
 0x191   :  { %v330_v39 = vadd.f32 %v368_v33, %v313_v35  ;;  %v312_v40 = vmul.f32 %v304_v34, %v265_v36 }
 0x192   :  { %v429_v41 = vpop.f32.mrf.mxu1 }
 0x193   :  { %339 = vst.msk [vmem:[%s606_s4 + $0x8] sm:$0xff] %vm337_vm3, %v330_v39  ;;  %v329_v44 = vadd.f32 %v367_v37, %v312_v40  ;;  %v315_v45 = vmul.f32 %v429_v41, %v307_v38 }
 0x194   :  { %v275_v46 = vpop.f32.mrf.mxu1 }
 0x195   :  { %338 = vst.msk [vmem:[%s606_s4] sm:$0xff] %vm337_vm3, %v329_v44  ;;  %v332_v49 = vadd.f32 %v370_v42, %v315_v45  ;;  %v314_v50 = vmul.f32 %v306_v43, %v275_v46 }
 0x196   :  { %v432_v51 = vpop.f32.mrf.mxu1 }
 0x197   :  { %341 = vst.msk [vmem:[%s606_s4 + $0x18] sm:$0xff] %vm337_vm3, %v332_v49  ;;  %v331_v54 = vadd.f32 %v369_v47, %v314_v50  ;;  %v317_v55 = vmul.f32 %v432_v51, %v309_v48 }
 0x198   :  { %v285_v56 = vpop.f32.mrf.mxu1 }
 0x199   :  { %340 = vst.msk [vmem:[%s606_s4 + $0x10] sm:$0xff] %vm337_vm3, %v331_v54  ;;  %v334_v59 = vadd.f32 %v372_v52, %v317_v55  ;;  %v316_v60 = vmul.f32 %v308_v53, %v285_v56 }
 0x19a   :  { %v435_v61 = vpop.f32.mrf.mxu1 }
 0x19b   :  { %343 = vst.msk [vmem:[%s606_s4 + $0x28] sm:$0xff] %vm337_vm3, %v334_v59  ;;  %v333_v0 = vadd.f32 %v371_v57, %v316_v60  ;;  %v319_v1 = vmul.f32 %v435_v61, %v311_v58 }
 0x19c   :  { %v295_v2 = vpop.f32.mrf.mxu1 }
 0x19d   :  { %342 = vst.msk [vmem:[%s606_s4 + $0x20] sm:$0xff] %vm337_vm3, %v333_v0  ;;  %v336_v4 = vadd.f32 %v374_v62, %v319_v1  ;;  %v318_v5 = vmul.f32 %v310_v63, %v295_v2 }
 0x19f   :  { %345 = vst.msk [vmem:[%s606_s4 + $0x38] sm:$0xff] %vm337_vm3, %v336_v4  ;;  %v335_v6 = vadd.f32 %v373_v3, %v318_v5 }
 0x1a1   :  { %344 = vst.msk [vmem:[%s606_s4 + $0x30] sm:$0xff] %vm337_vm3, %v335_v6 }

</bundles_post_ra>
